<compile_context>
chip_gen: v7x
topology: tpu7x:2x2x1
jax: 0.10.0
libtpu: 0.0.40
codegen_flags: <defaults>
</compile_context>

<pallas_src>
import functools
import numpy as np

import jax
import jax.numpy as jnp
from jax.experimental import pallas as pl
from jax.experimental.pallas import tpu as pltpu


# ----------------------------------------------------------------------------- host-side helpers

def _bilinear_weight_matrix(in_size: int, out_size: int) -> np.ndarray:
    """(out_size, in_size) interpolation matrix for align_corners=True bilinear."""
    W = np.zeros((out_size, in_size), dtype=np.float64)
    if out_size == 1 or in_size == 1:
        W[:, 0] = 1.0
        return W
    src = np.arange(out_size, dtype=np.float64) * (in_size - 1) / (out_size - 1)
    i0 = np.clip(np.floor(src).astype(np.int64), 0, in_size - 1)
    i1 = np.minimum(i0 + 1, in_size - 1)
    frac = src - i0
    rows = np.arange(out_size)
    np.add.at(W, (rows, i0), 1.0 - frac)
    np.add.at(W, (rows, i1), frac)
    return W


def _pad_crop_shifts(H: int, W: int, image_size: tuple[int, int]) -> tuple[int, int]:
    """Compose Pad((0, w_diff, 0, h_diff)) + CenterCrop(image_size) into index shifts.

    Returns (sh, sw) such that cropped[i, j] == raw[i + sh, j + sw] when that index
    is in range, else 0.  Faithfully reproduces torchvision's (left, top, right,
    bottom) Pad quirk of the original module and CenterCrop's implicit zero-pad.
    """
    Hc, Wc = image_size
    h_diff = max(0, Hc - H)
    w_diff = max(0, Wc - W)
    # v2.Pad(padding=(0, w_diff, 0, h_diff)) -> left=0, top=w_diff, right=0, bottom=h_diff
    pad_top, pad_left = w_diff, 0
    Hp, Wp = H + w_diff + h_diff, W
    # v2.CenterCrop(image_size): zero-pre-pad if smaller, then crop with round().
    cc_pt = (Hc - Hp) // 2 if Hc > Hp else 0
    cc_pb = (Hc - Hp + 1) // 2 if Hc > Hp else 0
    cc_pl = (Wc - Wp) // 2 if Wc > Wp else 0
    cc_pr = (Wc - Wp + 1) // 2 if Wc > Wp else 0
    Hp2, Wp2 = Hp + cc_pt + cc_pb, Wp + cc_pl + cc_pr
    crop_top = int(round((Hp2 - Hc) / 2.0))
    crop_left = int(round((Wp2 - Wc) / 2.0))
    sh = crop_top - cc_pt - pad_top
    sw = crop_left - cc_pl - pad_left
    return sh, sw


def _fold_crop_into_weights(w_base: np.ndarray, raw_size: int, shift: int) -> np.ndarray:
    """Fold 'cropped[i] = raw[i + shift] (else 0)' into a (out, raw_size) weight matrix."""
    out_size, crop_size = w_base.shape
    wf = np.zeros((out_size, raw_size), dtype=np.float64)
    lo = max(0, -shift)
    hi = min(crop_size, raw_size - shift)
    if hi > lo:
        wf[:, lo + shift:hi + shift] = w_base[:, lo:hi]
    return wf


def _round_up(x: int, m: int) -> int:
    return ((x + m - 1) // m) * m


# ----------------------------------------------------------------------------- Pallas kernel

def _preprocess_kernel(img_ref, wh_ref, ww_ref, o_ref, *, bt: int,
                       inv_scale: float, bias: float, mxu_dtype):
    # img_ref: (bt, H, W)       f32 raw greyscale images in [0, 1]
    # wh_ref : (Oh, H)          bf16 pure-bilinear row-interp matrix (pad/crop folded)
    # ww_ref : (W, Ow_pad)      bf16 pure-bilinear col-interp matrix (pad/crop folded, lane-padded)
    # o_ref  : (bt, Oh, Ow_pad) f32 normalized planes (3-channel repeat done outside)
    q = jnp.float32(256.0 - 1e-3)
    wh = wh_ref[...]
    ww = ww_ref[...]
    # TODO(synk): when H % 8 == 0 the bt images could be fused into one
    # (bt*H, W) @ (W, Ow_pad) matmul via a free reshape; for H = 450 that reshape
    # forces a sublane relayout, so we unroll per image (same MXU work).
    for b in range(bt):
        x = img_ref[b]
        # ToDtype(uint8, scale=True): clip reproduces uint8 clamping, then floor(x*(256-1e-3)).
        u = jnp.floor(jnp.clip(x, 0.0, 1.0) * q)
        # Quantized values are exact integers 0..255 -> exact in bf16.
        # W-contraction first: M = H (full MXU tiles), then H-contraction.
        t = jnp.dot(u.astype(mxu_dtype), ww, preferred_element_type=jnp.float32)  # (H, Ow_pad)
        r = jnp.dot(wh, t.astype(mxu_dtype), preferred_element_type=jnp.float32)  # (Oh, Ow_pad)
        # Normalize: f32 epilogue (scale NOT folded into bf16 weights -> free accuracy).
        o_ref[b] = r * inv_scale - bias


# ----------------------------------------------------------------------------- wrapper

class ImagePreprocessor:
    def __init__(self,
                 image_size: tuple[int, int] = (450, 450),
                 out_size: tuple[int, int] = (224, 224),
                 mu: float = 103.4862417561056,
                 sig: float = 56.745013435601074,
                 matmul_dtype=jnp.bfloat16,
                 batch_tile_cap: int = 4,
                 vmem_limit_bytes: int | None = None) -> None:
        # batch_tile_cap=4 keeps the double-buffered working set inside v7x's 32 MiB
        # scoped VMEM; on v5e/v6e (128 MiB) raise to 8-16 together with vmem_limit_bytes.
        self.image_size = tuple(image_size)
        self.out_size = tuple(out_size)
        self.mu = mu / 255.0                    # parity with the PyTorch module
        self.sig = sig / 255.0
        self._inv_scale = float(1.0 / sig)      # (r/255 - mu/255)/(sig/255) == r/sig - mu/sig
        self._bias = float(mu / sig)
        self._mxu_dtype = matmul_dtype
        self._bt_cap = int(batch_tile_cap)
        self._vmem_limit_bytes = vmem_limit_bytes
        self._cache = {}                        # (B, H, W) -> (pallas_call, wh, ww, Ow_pad)

    def _pick_batch_tile(self, B: int) -> int:
        # Largest tile <= cap that divides B and leaves >= 2 grid steps (so the
        # "parallel" batch axis can shard across v7x's two TensorCores).
        best = 1
        for d in range(2, min(self._bt_cap, B) + 1):
            if B % d == 0 and B // d >= 2:
                best = d
        return best

    def _build(self, B: int, H: int, W: int):
        key = (B, H, W)
        if key in self._cache:
            return self._cache[key]
        Hc, Wc = self.image_size
        Oh, Ow = self.out_size
        Ow_pad = _round_up(Ow, 128)                 # lane-dense output stores
        sh, sw = _pad_crop_shifts(H, W, self.image_size)

        # Pure bilinear weights with pad/crop folded in; Normalize scale stays f32 in the kernel.
        wh = _fold_crop_into_weights(_bilinear_weight_matrix(Hc, Oh), H, sh)    # (Oh, H)
        ww = _fold_crop_into_weights(_bilinear_weight_matrix(Wc, Ow), W, sw).T  # (W, Ow)
        ww = np.pad(ww, ((0, 0), (0, Ow_pad - Ow)))                             # zero lane padding
        wh = jnp.asarray(wh, dtype=self._mxu_dtype)
        ww = jnp.asarray(ww, dtype=self._mxu_dtype)

        bt = self._pick_batch_tile(B)
        grid = (B // bt,)

        kernel = functools.partial(_preprocess_kernel, bt=bt,
                                   inv_scale=self._inv_scale, bias=self._bias,
                                   mxu_dtype=self._mxu_dtype)

        wbytes = np.dtype(self._mxu_dtype).itemsize
        flops = 2 * B * (H * W * Ow_pad + Oh * H * Ow_pad)
        bytes_accessed = (B * H * W * 4 + B * Oh * Ow_pad * 4
                          + (Oh * H + W * Ow_pad) * wbytes)

        cparams = dict(dimension_semantics=("parallel",))
        if self._vmem_limit_bytes is not None:
            cparams["vmem_limit_bytes"] = int(self._vmem_limit_bytes)

        call = pl.pallas_call(
            kernel,
            out_shape=jax.ShapeDtypeStruct((B, Oh, Ow_pad), jnp.float32),
            grid=grid,
            in_specs=[
                # bt images per grid step, pipelined across the batch.
                pl.BlockSpec((bt, H, W), lambda i: (i, 0, 0)),
                # Weights: constant block index -> stay resident in VMEM across iterations.
                pl.BlockSpec((Oh, H), lambda i: (0, 0)),
                pl.BlockSpec((W, Ow_pad), lambda i: (0, 0)),
            ],
            out_specs=pl.BlockSpec((bt, Oh, Ow_pad), lambda i: (i, 0, 0)),
            compiler_params=pltpu.CompilerParams(**cparams),
            cost_estimate=pl.CostEstimate(flops=flops, transcendentals=0,
                                          bytes_accessed=bytes_accessed),
        )
        self._cache[key] = (call, wh, ww, Ow_pad)
        return call, wh, ww, Ow_pad

    def __call__(self, x: jnp.ndarray) -> jnp.ndarray:
        # Accepts (H, W), (1, H, W) single greyscale image, or (B, 1, H, W) batch.
        x = jnp.asarray(x, dtype=jnp.float32)
        squeeze_batch = False
        if x.ndim == 2:
            x = x[None]
        if x.ndim == 3:
            assert x.shape[0] == 1, "expected single-channel greyscale image"
            x = x[None]
            squeeze_batch = True
        B, C, H, W = x.shape
        assert C == 1, "expected single-channel greyscale images"

        call, wh, ww, Ow_pad = self._build(B, H, W)
        Oh, Ow = self.out_size
        y = call(x[:, 0], wh, ww)                       # (B, Oh, Ow_pad)
        y = y[:, :, :Ow]                                # strip lane padding
        # 3-channel repeat outside the kernel: XLA broadcast, fuses into consumers.
        # TODO(synk): if the consumer materializes NCHW, fold the repeat into its first conv.
        out = jnp.broadcast_to(y[:, None, :, :], (B, 3, Oh, Ow))
        return out[0] if squeeze_batch else out


# ----------------------------------------------------------------------------- reference + test

def _reference_numpy(x2d, image_size, out_size, mu, sig):
    """Pure-numpy rendering of the original PyTorch pipeline (single 2-D plane)."""
    Hc, Wc = image_size
    Oh, Ow = out_size
    u = np.floor(np.clip(x2d.astype(np.float64), 0.0, 1.0) * (256.0 - 1e-3))
    H, W = u.shape
    h_diff = max(0, Hc - H)
    w_diff = max(0, Wc - W)
    # v2.Pad((0, w_diff, 0, h_diff)) -> top=w_diff, bottom=h_diff, no width padding
    u = np.pad(u, ((w_diff, h_diff), (0, 0)))
    # v2.CenterCrop(image_size)
    Hp, Wp = u.shape
    pt = (Hc - Hp) // 2 if Hc > Hp else 0
    pb = (Hc - Hp + 1) // 2 if Hc > Hp else 0
    pleft = (Wc - Wp) // 2 if Wc > Wp else 0
    pright = (Wc - Wp + 1) // 2 if Wc > Wp else 0
    u = np.pad(u, ((pt, pb), (pleft, pright)))
    Hp, Wp = u.shape
    top = int(round((Hp - Hc) / 2.0))
    left = int(round((Wp - Wc) / 2.0))
    u = u[top:top + Hc, left:left + Wc]
    f = u / 255.0
    wh = _bilinear_weight_matrix(Hc, Oh)
    ww = _bilinear_weight_matrix(Wc, Ow)
    r = wh @ f @ ww.T
    y = (r - mu / 255.0) / (sig / 255.0)
    return np.broadcast_to(y[None], (3, Oh, Ow))


if __name__ == "__main__":
    key = jax.random.PRNGKey(0)
    B, H, W = 2, 28, 30   # smaller than image_size along both dims -> exercises pad/crop fold
    x = jax.random.uniform(key, (B, 1, H, W), dtype=jnp.float32)

    pre = ImagePreprocessor(image_size=(32, 32), out_size=(16, 16))

    out = jax.block_until_ready(pre(x))              # B=2 -> bt=1, grid=(2,)
    assert out.shape == (B, 3, 16, 16) and out.dtype == jnp.float32

    out1 = jax.block_until_ready(pre(x[0]))          # original single-image signature
    assert out1.shape == (3, 16, 16) and out1.dtype == jnp.float32

    x4 = jnp.concatenate([x, x], axis=0)             # B=4 -> bt=2, exercises batched grid step
    out4 = jax.block_until_ready(pre(x4))
    assert out4.shape == (4, 3, 16, 16) and out4.dtype == jnp.float32

    # Numerical check against the original pipeline (loose tol for bf16 MXU operands).
    x_np = np.asarray(x)
    for b in range(B):
        ref = _reference_numpy(x_np[b, 0], (32, 32), (16, 16),
                               103.4862417561056, 56.745013435601074)
        np.testing.assert_allclose(np.asarray(out[b]), ref, atol=0.1)
    np.testing.assert_allclose(np.asarray(out1), np.asarray(out[0]), atol=1e-4)
    np.testing.assert_allclose(np.asarray(out4[:2]), np.asarray(out), atol=1e-4)
    np.testing.assert_allclose(np.asarray(out4[2:]), np.asarray(out), atol=1e-4)

    print("KERNEL_OK")
</pallas_src>

<mosaic_0001>
module attributes {stable_mosaic.version = 11 : i64} {
  func.func @_preprocess_kernel(%arg0: i32, %arg1: memref<1x28x30xf32, #tpu.memory_space<vmem>>, %arg2: memref<16x28xbf16, #tpu.memory_space<vmem>>, %arg3: memref<30x128xbf16, #tpu.memory_space<vmem>>, %arg4: memref<1x16x128xf32, #tpu.memory_space<vmem>>) attributes {dimension_semantics = [#tpu.dimension_semantics<parallel>], iteration_bounds = array<i64: 2>, scalar_prefetch = 0 : i64, scratch_operands = 0 : i64, tpu.core_type = #tpu.core_type<tc>, window_params = [{transform_indices = @transform_0, window_bounds = array<i64: 1, 28, 30>}, {pipeline_mode = #tpu.pipeline_mode<synchronous>, transform_indices = @transform_1, window_bounds = array<i64: 16, 28>}, {pipeline_mode = #tpu.pipeline_mode<synchronous>, transform_indices = @transform_2, window_bounds = array<i64: 30, 128>}, {transform_indices = @transform_3, window_bounds = array<i64: 1, 16, 128>}]} {
    %c0 = arith.constant 0 : index
    %c0_0 = arith.constant 0 : index
    %0 = vector.load %arg2[%c0, %c0_0] : memref<16x28xbf16, #tpu.memory_space<vmem>>, vector<16x28xbf16>
    %c0_1 = arith.constant 0 : index
    %c0_2 = arith.constant 0 : index
    %1 = vector.load %arg3[%c0_1, %c0_2] : memref<30x128xbf16, #tpu.memory_space<vmem>>, vector<30x128xbf16>
    %c0_3 = arith.constant 0 : index
    %c0_4 = arith.constant 0 : index
    %c0_5 = arith.constant 0 : index
    %2 = vector.load %arg1[%c0_3, %c0_4, %c0_5] : memref<1x28x30xf32, #tpu.memory_space<vmem>>, vector<1x28x30xf32>
    %3 = vector.shape_cast %2 : vector<1x28x30xf32> to vector<28x30xf32>
    %cst = arith.constant 0.000000e+00 : f32
    %cst_6 = arith.constant 1.000000e+00 : f32
    %4 = vector.broadcast %cst : f32 to vector<28x30xf32>
    %5 = arith.maximumf %4, %3 : vector<28x30xf32>
    %6 = vector.broadcast %cst_6 : f32 to vector<28x30xf32>
    %7 = arith.minimumf %6, %5 : vector<28x30xf32>
    %cst_7 = arith.constant 2.559990e+02 : f32
    %8 = vector.broadcast %cst_7 : f32 to vector<28x30xf32>
    %9 = arith.mulf %7, %8 : vector<28x30xf32>
    %10 = math.floor %9 : vector<28x30xf32>
    %11 = arith.truncf %10 : vector<28x30xf32> to vector<28x30xbf16>
    %cst_8 = arith.constant dense<0.000000e+00> : vector<28x128xf32>
    %12 = tpu.matmul %11, %1, %cst_8 {dimension_numbers = #tpu.dot_dimension_numbers<[1], [0], [0], [1], [0, 0, 1, 1], [], []>} : vector<28x30xbf16>, vector<30x128xbf16>, vector<28x128xf32> -> vector<28x128xf32>
    %13 = arith.truncf %12 : vector<28x128xf32> to vector<28x128xbf16>
    %cst_9 = arith.constant dense<0.000000e+00> : vector<16x128xf32>
    %14 = tpu.matmul %0, %13, %cst_9 {dimension_numbers = #tpu.dot_dimension_numbers<[1], [0], [0], [1], [0, 0, 1, 1], [], []>} : vector<16x28xbf16>, vector<28x128xbf16>, vector<16x128xf32> -> vector<16x128xf32>
    %cst_10 = arith.constant 0.0176226944 : f32
    %15 = vector.broadcast %cst_10 : f32 to vector<16x128xf32>
    %16 = arith.mulf %14, %15 : vector<16x128xf32>
    %cst_11 = arith.constant 1.82370639 : f32
    %17 = vector.broadcast %cst_11 : f32 to vector<16x128xf32>
    %18 = arith.subf %16, %17 : vector<16x128xf32>
    %c0_12 = arith.constant 0 : index
    %c0_13 = arith.constant 0 : index
    %c0_14 = arith.constant 0 : index
    %19 = vector.load %arg4[%c0_12, %c0_13, %c0_14] : memref<1x16x128xf32, #tpu.memory_space<vmem>>, vector<1x16x128xf32>
    %20 = vector.shape_cast %19 : vector<1x16x128xf32> to vector<16x128xf32>
    %21 = vector.shape_cast %18 : vector<16x128xf32> to vector<1x16x128xf32>
    tpu.vector_store %arg4[%c0_12, %c0_13, %c0_14], %21 {strides = array<i32>} : memref<1x16x128xf32, #tpu.memory_space<vmem>>, vector<1x16x128xf32>,
    return
  }
  func.func @transform_0(%arg0: i32) -> (i32, i32, i32) {
    %c0_i32 = arith.constant 0 : i32
    %c0_i32_0 = arith.constant 0 : i32
    %c0_i32_1 = arith.constant 0 : i32
    return %arg0, %c0_i32, %c0_i32_0 : i32, i32, i32
  }
  func.func @transform_1(%arg0: i32) -> (i32, i32) {
    %c0_i32 = arith.constant 0 : i32
    %c0_i32_0 = arith.constant 0 : i32
    %c0_i32_1 = arith.constant 0 : i32
    return %c0_i32, %c0_i32_0 : i32, i32
  }
  func.func @transform_2(%arg0: i32) -> (i32, i32) {
    %c0_i32 = arith.constant 0 : i32
    %c0_i32_0 = arith.constant 0 : i32
    %c0_i32_1 = arith.constant 0 : i32
    return %c0_i32, %c0_i32_0 : i32, i32
  }
  func.func @transform_3(%arg0: i32) -> (i32, i32, i32) {
    %c0_i32 = arith.constant 0 : i32
    %c0_i32_0 = arith.constant 0 : i32
    %c0_i32_1 = arith.constant 0 : i32
    return %arg0, %c0_i32, %c0_i32_0 : i32, i32, i32
  }
}

</mosaic_0001>

<bundles_post_ra>
// kernel: tpu_custom_call.1
= control target key start
LH: loop header
LB: loop body
LE: loop exit
PB: predicated region body
PF: predicated region fallthrough
CT: control target
= control target key end

     0   :  { %8 = vsyncpa [#allocation3], 0  ;;  %s700_s0 = inlined_call_operand.vmem [shape: f32[2,28,30], index: 0, kind: input, shape index: {}]   ;;  %s701_s1 = inlined_call_operand.vmem [shape: bf16[16,28], index: 1, kind: input, shape index: {}]   ;;  %s702_s2 = inlined_call_operand.vmem [shape: bf16[30,128], index: 2, kind: input, shape index: {}]   ;;  %s703_s3 = inlined_call_operand.hbm [shape: f32[2,16,128], index: 3, kind: output, shape index: {}]  }
   0x1   :  { %10 = vsyncpa [#allocation3 + $0x1], 0  ;;  %s588_s12 = smov 0   ;;  %s590_s13 = smov 0  }
   0x2   :  { %s592_s14 = smov 0   ;;  %s594_s15 = smov 0  }
   0x3 LB: > { %s609_s16 = sadd.s32 4294967295, %s561_s15   ;;  %s407_s17 = sadd.s32 4294967294, %s561_s15   ;;  %s561_s15 = sphi %s594_s15, %s709_s15   ;;  %s557_s14 = sphi %s592_s14, %s708_s14   ;;  %s553_s13 = sphi %s590_s13, %s707_s13   ;;  %s549_s12 = sphi %s588_s12, %s706_s12  }
   0x4   : > { %s613_s18 = sadd.s32 1, %s561_s15   ;;  %s91_s19 = sadd.s32 1, %s557_s14 }
   0x5   : > { %s88_s20 = ssub.s32 %s561_s15, %s613_s18  ;;  %p101_p0 = scmp.ne.s32.totalorder %s557_s14, %s553_s13 }
   0x6   : > { %p89_p1 = scmp.eq.s32.totalorder %s88_s20, 0  ;;  %p102_p2 = scmp.eq.s32.totalorder %s609_s16, 1 }
   0x7   : > { %p107_p3 = scmp.ne.s32.totalorder %s553_s13, %s549_s12  ;;  %p108_p4 = scmp.eq.s32.totalorder %s407_s17, 1 }
   0x8   : > { %s624_s21 = scalar_select %p89_p1, %s557_s14, %s91_s19  }
   0x9   : > { %p626_p5 = por %p102_p2, %p101_p0  ;;  %p630_p6 = por %p108_p4, %p107_p3 }
   0xa   : > { %p410_p7 = scmp.ge.s32.totalorder %s561_s15, 1  ;;  %p140_p8 = scmp.lt.s32.totalorder %s561_s15, 3 }
   0xc   : > { %p141_p9 = pnand %p410_p7, %p140_p8 }
   0xd   : > { %v496_v0 = vld [vmem:[%s702_s2] sm:$0xff] (!%p141_p9)   ;;  %vm216_vm0 = vcmask (!%p141_p9), 1046528   ;;  %v497_v1 = vld [vmem:[%s702_s2 + $0x8] sm:$0x7f] (!%p141_p9)   ;;  %p164_p10 = scmp.lt.s32.totalorder (!%p141_p9), %s609_s16, 1  ;;  %vm209_vm1 = vcmask (!%p141_p9), 244736  }
   0xe   : > { %144 = sbr.rel (%p141_p9) target bundleno = 494 (0x1ee), region = 32  ;;  %436 = vmatprep.subr.bf16.mxu0 (!%p141_p9), %v496_v0  ;;  %v218_v2 = vsel (!%p141_p9), %vm216_vm0, %v497_v1, 0  ;;  %v563_v25 = vmov (!%p141_p9), 0.0   ;;  %vm564_vm2 = vmmov (!%p141_p9), 0   ;;  %vm280_vm3 = vcmask (!%p141_p9), 1045504   ;;  %v498_v33 = vld [vmem:[%s701_s1] sm:$0xff] (!%p141_p9)  }
   0xf   : > { %437 = vmatpush3.bf16.msra.mxu0 (!%p141_p9), %v496_v0  ;;  %444 = vmatprep.subr.bf16.mxu1 (!%p141_p9), %v563_v25  ;;  %vm276_vm4 = vcmask (!%p141_p9), 228352   ;;  %s161_s8 = sand.u32 (!%p141_p9), 1, %s553_s13   ;;  %s428_s17 = sshll.u32 (!%p141_p9), %s609_s16, 8 }
  0x10   : > { %452 = vmatprep.subr.msk.bf16.mxu0 (!%p141_p9), %vm216_vm0, %v497_v1  ;;  %448 = vmatprep.mubr.msk.bf16.mxu1 (!%p141_p9), %vm564_vm2, %v563_v25  ;;  %s411_s9 = sshll.u32 (!%p141_p9), %s161_s8, 4  ;;  %s657_s24 = scalar_lea.hbm (!%p141_p9), %s703_s3, %s428_s17 }
  0x11   : > { %s163_s10 = scalar_lea.vmem (!%p141_p9), [#allocation2], %s411_s9  ;;  %s659_s25 = scalar_lea.sflag (!%p141_p9), [#allocation3], %s161_s8 }
  0x12   : > { %s345_s11 = sshll.u32 (!%p141_p9), %s163_s10, 4  ;;  %s565_s26 = smov (!%p141_p9), [#allocation2]   ;;  %s652_s11 = int_to_ptr.vmem [resolvable:$true] %s345_s11 }
  0x13   : > { %439 = vmatpush3.bf16.msra.mxu0 (!%p141_p9), %v218_v2  ;;  %s503_s27 = sshll.u32 (!%p141_p9), %s565_s26, 4  ;;  %s504_s27 = int_to_ptr.vmem [resolvable:$false] %s503_s27 }
  0x14   : > { %p506_p0 = scmp.lt.s32.totalorder (!%p141_p9), %s652_s11, %s504_s27 }
  0x15   : > { %s165_s28 = scalar_select %p164_p10, %s609_s16, 1 }
  0x16   : > { %s499_s16 = scalar_lea.vmem %s652_s11, 256 }
  0x17   : > { %s427_s29 = sshll.u32 %s165_s28, 5  ;;  %p500_p11 = scmp.ne.s32.totalorder %s652_s11, %s499_s16 }
  0x18   : > { %s168_s5 = scalar_lea.vmem %s700_s0, %s427_s29  ;;  %s505_s28 = scalar_lea.vmem %s504_s27, 512 }
  0x19   : > { %v176_v3 = vld [vmem:[%s168_s5] sm:$0xff]  ;;  %v177_v4 = vld [vmem:[%s168_s5 + $0x8] sm:$0xff]  ;;  %v178_v5 = vld [vmem:[%s168_s5 + $0x10] sm:$0xff]  ;;  %p501_p12 = pnand %p500_p11, %p626_p5  ;;  %p507_p1 = scmp.lt.s32.totalorder %s505_s28, %s499_s16 }
  0x1a   : > { %v180_v6 = vmax.f32 %v176_v3, 0.0  ;;  %v181_v7 = vmax.f32 %v177_v4, 0.0  ;;  %v179_v8 = vld [vmem:[%s168_s5 + $0x18] sm:$0xf]  ;;  %v182_v9 = vmax.f32 %v178_v5, 0.0 }
  0x1b   : > { %v183_v10 = vmax.f32 %v179_v8, 0.0  ;;  %p502_p13 = pneg %p501_p12  ;;  %p508_p2 = por %p507_p1, %p506_p0 }
  0x1c   : > { %v184_v11 = vmin.f32 %v180_v6, 1.0  ;;  %v185_v12 = vmin.f32 %v181_v7, 1.0  ;;  %v186_v13 = vmin.f32 %v182_v9, 1.0 }
  0x1d   : > { %v187_v14 = vmin.f32 %v183_v10, 1.0  ;;  %p509_p3 = pnand %p508_p2, %p502_p13 }
  0x1e   : > { %v188_v15 = vmul.f32 255.999, %v184_v11  ;;  %v189_v16 = vmul.f32 255.999, %v185_v12  ;;  %v190_v17 = vmul.f32 255.999, %v186_v13 }
  0x1f   : > { %v191_v18 = vmul.f32 255.999, %v187_v14 }
  0x20   : > { %v192_v19 = vfloor.f32 %v188_v15  ;;  %v193_v20 = vfloor.f32 %v189_v16  ;;  %v194_v21 = vfloor.f32 %v190_v17 }
  0x21   : > { %v195_v22 = vfloor.f32 %v191_v18 }
  0x22   : > { %v196_v23 = vpack.c.bf16 %v193_v20, %v192_v19 }
  0x23   : > { %v197_v24 = vpack.c.bf16 %v195_v22, %v194_v21 }
  0x24   : > { %440 = vmatprep.mubr.msk.bf16.mxu0 %vm209_vm1, %v196_v23 }
  0x25   : > { %441 = vmatmul.mubr.msk.bf16.vlgmr.msra.gmra.mrb[0].mxu0 %vm209_vm1, %v197_v24 }
  0xf8   : > { %v442_v26 = vpop.f32.mrb[0].mxu0 }
  0xf9   : > { %v254_v27 = vpop.f32.mrb[1].mxu0 }
  0xfa   : > { %v443_v28 = vpop.f32.mrb[2].mxu0 }
  0xfb   : > { %v270_v29 = vpack.c.bf16 %v443_v28, %v442_v26  ;;  %v257_v30 = vpop.f32.mrb[3].mxu0 }
  0xfc   : > { %v269_v31 = vpack.c.bf16 %v257_v30, %v254_v27 }
  0xfd   : > { %v282_v32 = vsel %vm280_vm3, %v270_v29, 0 }
  0xfe   : > { %445 = vmatpush3.bf16.msra.mxu1 %v269_v31 }
  0xff   : > { %446 = vmatprep.subr.bf16.mxu1 %v563_v25 }
 0x102   : > { %447 = vmatpush3.bf16.msra.mxu1 %v282_v32 }
 0x105   : > { %449 = vmatmul.mubr.msk.bf16.vlgmr.msra.gmra.mrb[0].mxu1 %vm276_vm4, %v498_v33 }
 0x1d8   : > { %v318_v34 = vpop.f32.mrb[0].mxu1 }
 0x1d9   : > { %v325_v35 = vmul.f32 0.017622694, %v318_v34  ;;  %v450_v36 = vpop.f32.mrb[1].mxu1 }
 0x1da   : > { %v321_v37 = vpop.f32.mrb[2].mxu1 }
 0x1db   : > { %v420_v38 = vadd.f32 -1.8237064, %v325_v35  ;;  %v326_v39 = vmul.f32 0.017622694, %v321_v37  ;;  %v451_v40 = vpop.f32.mrb[3].mxu1 }
 0x1dd   : > { %329 = vst [vmem:[%s163_s10] sm:$0xff] %v420_v38  ;;  %v421_v41 = vadd.f32 -1.8237064, %v326_v39 }
 0x1df   : > { %330 = vst [vmem:[%s163_s10 + $0x8] sm:$0xff] %v421_v41 }
 0x1e0   : > { %512 = shalt.err (!%p509_p3)
}
 0x1e1   : > { %s513_s29 = scalar_lea.hbm %s657_s24, 256  ;;  %s517_s5 = scalar_lea.hbm %s703_s3, 512 }
 0x1e2   : > { %p514_p4 = scmp.ne.s32.totalorder %s657_s24, %s513_s29  ;;  %p518_p9 = scmp.lt.u32.totalorder %s657_s24, %s703_s3 }
 0x1e3   : > { %p519_p10 = scmp.lt.u32.totalorder %s517_s5, %s513_s29  ;;  %p521_p12 = scmp.lt.u32.totalorder %s513_s29, %s657_s24 }
 0x1e4   : > { %p515_p7 = pnand %p514_p4, %p626_p5 }
 0x1e5   : > { %p520_p11 = por %p519_p10, %p518_p9 }
 0x1e6   : > { %p516_p8 = pneg %p515_p7 }
 0x1e7   : > { %p522_p13 = por %p521_p12, %p520_p11 }
 0x1e9   : > { %p523_p0 = pnand %p522_p13, %p516_p8 }
 0x1eb   : > { %526 = shalt.err (!%p523_p0)
}
 0x1ec   : > { %s566_s8 = smov 128   ;;  %s567_s9 = smov 8  }
 0x1ed   : > { %453 = dma.vmem_to_hbm [thread:$0]  (%p626_p5), %s652_s11, 256, %s657_s24, %s659_s25, %s566_s8, %s566_s8, %s567_s9  }
 0x1ee PF: > { %p459_p1 = scmp.ge.s32.totalorder %s561_s15, 2  ;;  %s360_s10 = sand.u32 1, %s549_s12  }
 0x1ef   : > { %s361_s17 = scalar_lea.sflag [#allocation3], %s360_s10 }
 0x1f0   : > { %p456_p2 = pnand %p459_p1, %p630_p6 }
 0x1f2   : > { %544 = dma.done.wait (!%p456_p2), %s361_s17, 256  }
 0x1f3   : > { %546 = vsyncadd (!%p456_p2), %s361_s17, 4294967040  ;;  %p13_p3 = scmp.ge.s32.totalorder %s613_s18, 4   ;;  %s706_s12 = smov %s553_s13 }
 0x1f4   : > { %s707_s13 = smov %s557_s14  ;;  %s708_s14 = smov %s624_s21 }
 0x1f5   : > { %s709_s15 = smov %s613_s18  ;;  %15 = sbr.rel (!%p13_p3) target bundleno = 3 (0x3), region = 67 }
 0x1fc   :  { %366 = vsyncpa [#allocation3], 1 }
 0x1fd   :  { %368 = vsyncpa [#allocation3 + $0x1], 1 }

</bundles_post_ra>
